<compile_context>
chip_gen: v7x
topology: tpu7x:2x2x1
jax: 0.10.0
libtpu: 0.0.40
codegen_flags: <defaults>
</compile_context>

<pallas_src>
import functools

import jax
import jax.numpy as jnp
from jax.experimental import pallas as pl
from jax.experimental.pallas import tpu as pltpu


def _pair(v):
    if isinstance(v, int):
        return v, v
    v = tuple(v)
    if len(v) == 1:
        return v[0], v[0]
    return v[0], v[1]


def _maxpool_kernel(x_ref, o_ref, *, kh, kw, sh, sw, h_out, w_out):
    # x_ref: (1, sh*sw, Ho2, Wo2, TC)   o_ref: (1, h_out, w_out, TC)
    acc = None
    for r in range(kh):          # static KH*KW window taps (e.g. 9 for 3x3)
        for s in range(kw):
            phase = (r % sh) * sw + (s % sw)
            win = x_ref[0, phase,
                        pl.ds(r // sh, h_out),
                        pl.ds(s // sw, w_out), :]
            acc = win if acc is None else jnp.maximum(acc, win)
    o_ref[0] = acc


def maxpool2d_static_same_padding(x, kernel_size, stride=None):
    """Forward pass of MaxPool2dStaticSamePadding for NCHW `x`."""
    if stride is None:
        stride = kernel_size             # nn.MaxPool2d default
    kh, kw = _pair(kernel_size)
    sh, sw = _pair(stride)
    # TODO(synk): dilation != 1, ceil_mode=True and return_indices of
    # nn.MaxPool2d are not implemented (defaults assumed, as in the module).

    n, c, h, w = x.shape
    h_out = -(-h // sh)                  # ceil(h / sh)
    w_out = -(-w // sw)

    # Static SAME padding, exactly as the PyTorch module computes it.
    extra_v = (h_out - 1) * sh - h + kh
    extra_h = (w_out - 1) * sw - w + kw
    top = extra_v // 2
    bottom = extra_v - top
    left = extra_h // 2
    right = extra_h - left

    # Channels onto lanes: NCHW -> NHWC.
    xt = jnp.transpose(x, (0, 2, 3, 1))

    # F.pad semantics: zero padding; negative amounts crop (lax.pad handles both).
    xp = jax.lax.pad(xt, jnp.zeros((), xt.dtype),
                     ((0, 0, 0), (top, bottom, 0), (left, right, 0), (0, 0, 0)))

    # Extra (never-read) zero rows/cols so padded H/W become multiples of the
    # stride, enabling the phase decomposition below.
    ho2 = h_out + (kh - 1) // sh
    wo2 = w_out + (kw - 1) // sw
    hp_same = (h_out - 1) * sh + kh
    wp_same = (w_out - 1) * sw + kw
    xp = jnp.pad(xp, ((0, 0), (0, sh * ho2 - hp_same), (0, sw * wo2 - wp_same), (0, 0)))

    # (N, Hp2, Wp2, C) -> (N, sh*sw, Ho2, Wo2, C): padded pixel (ho*sh+r, wo*sw+s)
    # lives at [n, r*sw+s, ho, wo, :], so window tap (r, s) of every output pixel
    # is one contiguous slice.
    xr = xp.reshape(n, ho2, sh, wo2, sw, c)
    xr = jnp.transpose(xr, (0, 2, 4, 1, 3, 5)).reshape(n, sh * sw, ho2, wo2, c)

    # Block channels when they are lane-dense; otherwise take the full extent.
    if c % 256 == 0:
        tc = 256
    elif c % 128 == 0:
        tc = 128
    else:
        tc = c
    grid = (n, c // tc)

    kernel = functools.partial(_maxpool_kernel, kh=kh, kw=kw, sh=sh, sw=sw,
                               h_out=h_out, w_out=w_out)

    out_nhwc = pl.pallas_call(
        kernel,
        out_shape=jax.ShapeDtypeStruct((n, h_out, w_out, c), x.dtype),
        grid_spec=pltpu.PrefetchScalarGridSpec(
            num_scalar_prefetch=0,
            grid=grid,
            in_specs=[pl.BlockSpec((1, sh * sw, ho2, wo2, tc),
                                   lambda b, cb: (b, 0, 0, 0, cb))],
            out_specs=pl.BlockSpec((1, h_out, w_out, tc),
                                   lambda b, cb: (b, 0, 0, cb)),
        ),
        compiler_params=pltpu.CompilerParams(
            dimension_semantics=("parallel", "parallel"),
            vmem_limit_bytes=32 * 1024 * 1024,
        ),
    )(xr)

    # NHWC -> NCHW
    return jnp.transpose(out_nhwc, (0, 3, 1, 2))


def _reference(x, kernel_size, stride):
    """Pure-XLA reference: F.pad(zeros) + MaxPool2d(VALID)."""
    kh, kw = _pair(kernel_size)
    sh, sw = _pair(stride)
    h, w = x.shape[-2:]
    extra_v = (-(-h // sh) - 1) * sh - h + kh
    extra_h = (-(-w // sw) - 1) * sw - w + kw
    top = extra_v // 2
    bottom = extra_v - top
    left = extra_h // 2
    right = extra_h - left
    xp = jnp.pad(x, ((0, 0), (0, 0), (top, bottom), (left, right)))
    return jax.lax.reduce_window(xp, -jnp.inf, jax.lax.max,
                                 (1, 1, kh, kw), (1, 1, sh, sw), "VALID")


if __name__ == "__main__":
    key = jax.random.PRNGKey(0)
    x = jax.random.normal(key, (2, 4, 16, 16), dtype=jnp.float32)  # NCHW

    fwd = jax.jit(maxpool2d_static_same_padding,
                  static_argnames=("kernel_size", "stride"))

    ok = True
    for ks, st in ((3, 2), (2, 2)):   # (3, 2) is the canonical EfficientDet config
        y = fwd(x, kernel_size=ks, stride=st)
        jax.block_until_ready(y)
        ref = _reference(x, ks, st)
        ok = ok and (y.shape == ref.shape) and bool(jnp.allclose(y, ref))
    if ok:
        print("KERNEL_OK")
</pallas_src>

<mosaic_0001>
module attributes {stable_mosaic.version = 11 : i64} {
  func.func @_maxpool_kernel(%arg0: i32, %arg1: i32, %arg2: memref<1x4x9x9x4xf32, #tpu.memory_space<vmem>>, %arg3: memref<1x8x8x4xf32, #tpu.memory_space<vmem>>) attributes {dimension_semantics = [#tpu.dimension_semantics<parallel>, #tpu.dimension_semantics<parallel>], iteration_bounds = array<i64: 2, 1>, scalar_prefetch = 0 : i64, scratch_operands = 0 : i64, tpu.core_type = #tpu.core_type<tc>, window_params = [{transform_indices = @transform_0, window_bounds = array<i64: 1, 4, 9, 9, 4>}, {transform_indices = @transform_1, window_bounds = array<i64: 1, 8, 8, 4>}]} {
    %c0 = arith.constant 0 : index
    %c0_0 = arith.constant 0 : index
    %c0_1 = arith.constant 0 : index
    %c0_2 = arith.constant 0 : index
    %c0_3 = arith.constant 0 : index
    %0 = vector.load %arg2[%c0, %c0_0, %c0_1, %c0_2, %c0_3] : memref<1x4x9x9x4xf32, #tpu.memory_space<vmem>>, vector<1x1x8x8x4xf32>
    %1 = vector.shape_cast %0 : vector<1x1x8x8x4xf32> to vector<8x8x4xf32>
    %c0_4 = arith.constant 0 : index
    %c1 = arith.constant 1 : index
    %c0_5 = arith.constant 0 : index
    %c0_6 = arith.constant 0 : index
    %c0_7 = arith.constant 0 : index
    %2 = vector.load %arg2[%c0_4, %c1, %c0_5, %c0_6, %c0_7] : memref<1x4x9x9x4xf32, #tpu.memory_space<vmem>>, vector<1x1x8x8x4xf32>
    %3 = vector.shape_cast %2 : vector<1x1x8x8x4xf32> to vector<8x8x4xf32>
    %4 = arith.maximumf %1, %3 : vector<8x8x4xf32>
    %c0_8 = arith.constant 0 : index
    %c0_9 = arith.constant 0 : index
    %c0_10 = arith.constant 0 : index
    %c1_11 = arith.constant 1 : index
    %c0_12 = arith.constant 0 : index
    %5 = vector.load %arg2[%c0_8, %c0_9, %c0_10, %c1_11, %c0_12] : memref<1x4x9x9x4xf32, #tpu.memory_space<vmem>>, vector<1x1x8x8x4xf32>
    %6 = vector.shape_cast %5 : vector<1x1x8x8x4xf32> to vector<8x8x4xf32>
    %7 = arith.maximumf %4, %6 : vector<8x8x4xf32>
    %c0_13 = arith.constant 0 : index
    %c2 = arith.constant 2 : index
    %c0_14 = arith.constant 0 : index
    %c0_15 = arith.constant 0 : index
    %c0_16 = arith.constant 0 : index
    %8 = vector.load %arg2[%c0_13, %c2, %c0_14, %c0_15, %c0_16] : memref<1x4x9x9x4xf32, #tpu.memory_space<vmem>>, vector<1x1x8x8x4xf32>
    %9 = vector.shape_cast %8 : vector<1x1x8x8x4xf32> to vector<8x8x4xf32>
    %10 = arith.maximumf %7, %9 : vector<8x8x4xf32>
    %c0_17 = arith.constant 0 : index
    %c3 = arith.constant 3 : index
    %c0_18 = arith.constant 0 : index
    %c0_19 = arith.constant 0 : index
    %c0_20 = arith.constant 0 : index
    %11 = vector.load %arg2[%c0_17, %c3, %c0_18, %c0_19, %c0_20] : memref<1x4x9x9x4xf32, #tpu.memory_space<vmem>>, vector<1x1x8x8x4xf32>
    %12 = vector.shape_cast %11 : vector<1x1x8x8x4xf32> to vector<8x8x4xf32>
    %13 = arith.maximumf %10, %12 : vector<8x8x4xf32>
    %c0_21 = arith.constant 0 : index
    %c2_22 = arith.constant 2 : index
    %c0_23 = arith.constant 0 : index
    %c1_24 = arith.constant 1 : index
    %c0_25 = arith.constant 0 : index
    %14 = vector.load %arg2[%c0_21, %c2_22, %c0_23, %c1_24, %c0_25] : memref<1x4x9x9x4xf32, #tpu.memory_space<vmem>>, vector<1x1x8x8x4xf32>
    %15 = vector.shape_cast %14 : vector<1x1x8x8x4xf32> to vector<8x8x4xf32>
    %16 = arith.maximumf %13, %15 : vector<8x8x4xf32>
    %c0_26 = arith.constant 0 : index
    %c0_27 = arith.constant 0 : index
    %c1_28 = arith.constant 1 : index
    %c0_29 = arith.constant 0 : index
    %c0_30 = arith.constant 0 : index
    %17 = vector.load %arg2[%c0_26, %c0_27, %c1_28, %c0_29, %c0_30] : memref<1x4x9x9x4xf32, #tpu.memory_space<vmem>>, vector<1x1x8x8x4xf32>
    %18 = vector.shape_cast %17 : vector<1x1x8x8x4xf32> to vector<8x8x4xf32>
    %19 = arith.maximumf %16, %18 : vector<8x8x4xf32>
    %c0_31 = arith.constant 0 : index
    %c1_32 = arith.constant 1 : index
    %c1_33 = arith.constant 1 : index
    %c0_34 = arith.constant 0 : index
    %c0_35 = arith.constant 0 : index
    %20 = vector.load %arg2[%c0_31, %c1_32, %c1_33, %c0_34, %c0_35] : memref<1x4x9x9x4xf32, #tpu.memory_space<vmem>>, vector<1x1x8x8x4xf32>
    %21 = vector.shape_cast %20 : vector<1x1x8x8x4xf32> to vector<8x8x4xf32>
    %22 = arith.maximumf %19, %21 : vector<8x8x4xf32>
    %c0_36 = arith.constant 0 : index
    %c0_37 = arith.constant 0 : index
    %c1_38 = arith.constant 1 : index
    %c1_39 = arith.constant 1 : index
    %c0_40 = arith.constant 0 : index
    %23 = vector.load %arg2[%c0_36, %c0_37, %c1_38, %c1_39, %c0_40] : memref<1x4x9x9x4xf32, #tpu.memory_space<vmem>>, vector<1x1x8x8x4xf32>
    %24 = vector.shape_cast %23 : vector<1x1x8x8x4xf32> to vector<8x8x4xf32>
    %25 = arith.maximumf %22, %24 : vector<8x8x4xf32>
    %c0_41 = arith.constant 0 : index
    %c0_42 = arith.constant 0 : index
    %c0_43 = arith.constant 0 : index
    %c0_44 = arith.constant 0 : index
    %26 = vector.load %arg3[%c0_41, %c0_42, %c0_43, %c0_44] : memref<1x8x8x4xf32, #tpu.memory_space<vmem>>, vector<1x8x8x4xf32>
    %27 = vector.shape_cast %26 : vector<1x8x8x4xf32> to vector<8x8x4xf32>
    %28 = vector.shape_cast %25 : vector<8x8x4xf32> to vector<1x8x8x4xf32>
    tpu.vector_store %arg3[%c0_41, %c0_42, %c0_43, %c0_44], %28 {strides = array<i32>} : memref<1x8x8x4xf32, #tpu.memory_space<vmem>>, vector<1x8x8x4xf32>,
    return
  }
  func.func @transform_0(%arg0: i32, %arg1: i32) -> (i32, i32, i32, i32, i32) {
    %c0_i32 = arith.constant 0 : i32
    %c0_i32_0 = arith.constant 0 : i32
    %c0_i32_1 = arith.constant 0 : i32
    %c0_i32_2 = arith.constant 0 : i32
    return %arg0, %c0_i32, %c0_i32_0, %c0_i32_1, %arg1 : i32, i32, i32, i32, i32
  }
  func.func @transform_1(%arg0: i32, %arg1: i32) -> (i32, i32, i32, i32) {
    %c0_i32 = arith.constant 0 : i32
    %c0_i32_0 = arith.constant 0 : i32
    %c0_i32_1 = arith.constant 0 : i32
    return %arg0, %c0_i32, %c0_i32_0, %arg1 : i32, i32, i32, i32
  }
}

</mosaic_0001>

<bundles_post_ra>
// kernel: maxpool2d_static_same_padding.1
= control target key start
LH: loop header
LB: loop body
LE: loop exit
PB: predicated region body
PF: predicated region fallthrough
CT: control target
= control target key end

     0   :  { %s507_s6 = smov 0   ;;  %s509_s7 = smov 0   ;;  %s655_s0 = inlined_call_operand.vmem [shape: f32[2,4,9,9,4], index: 0, kind: input, shape index: {}]   ;;  %s656_s1 = inlined_call_operand.vmem [shape: f32[2,8,8,4], index: 1, kind: output, shape index: {}]  }
   0x1   :  { %s511_s8 = smov 0  }
   0x2 LB: > { %s23_s9 = sadd.s32 1, %s491_s7  ;;  %p385_p0 = scmp.ge.s32.totalorder %s495_s8, 1  ;;  %s495_s8 = sphi %s511_s8, %s11_s8   ;;  %s491_s7 = sphi %s509_s7, %s658_s7   ;;  %s487_s6 = sphi %s507_s6, %s657_s6  }
   0x3   : > { %p25_p1 = scmp.ge.s32.totalorder %s23_s9, 2  ;;  %p106_p2 = scmp.lt.s32.totalorder %s495_s8, 3 }
   0x5   : > { %s660_s9 = smov (%p25_p1, %s23_s9), 0  ;;  %p107_p3 = pnand %p385_p0, %p106_p2 }
   0x6   : > { %p132_p4 = scmp.lt.s32.totalorder (!%p107_p3), %s487_s6, 1  ;;  %vm289_vm0 = vcmask (!%p107_p3), 31744  }
   0x7   : > { %110 = sbr.rel (%p107_p3) target bundleno = 55 (0x37), region = 24 }
   0xe   : > { %s662_s6 = smov (!%p132_p4, %s487_s6), 1 }
   0xf   : > { %s448_s10 = smul.u32 576, %s662_s6  ;;  %s447_s14 = sshll.u32 %s662_s6, 6 }
  0x10   : > { %s603_s17 = scalar_lea.vmem %s656_s1, %s447_s14 }
  0x11   : > { %s531_s13 = scalar_lea.vmem %s655_s0, %s448_s10 }
  0x12   : > { %v148_v0 = vld [vmem:[%s531_s13] sm:$0xff]  ;;  %v389_v1 = vld [vmem:[%s531_s13 + $0x90] sm:$0xff] }
  0x13   : > { %v173_v2 = vld [vmem:[%s531_s13 + $0x1] sm:$0xff]  ;;  %v165_v3 = vmax.f32 %v148_v0, %v389_v1  ;;  %v421_v5 = vld [vmem:[%s531_s13 + $0x10] sm:$0xff] }
  0x14   : > { %v397_v4 = vld [vmem:[%s531_s13 + $0x120] sm:$0xff]  ;;  %v542_v7 = vld [vmem:[%s531_s13 + $0x11] sm:$0xff] }
  0x15   : > { %v539_v6 = vld [vmem:[%s531_s13 + $0xa0] sm:$0xff]  ;;  %v181_v8 = vmax.f32 %v165_v3, %v173_v2  ;;  %v405_v9 = vld [vmem:[%s531_s13 + $0x1b0] sm:$0xff] }
  0x16   : > { %v166_v10 = vmax.f32 %v421_v5, %v539_v6  ;;  %v398_v11 = vld [vmem:[%s531_s13 + $0x130] sm:$0xff]  ;;  %v422_v12 = vld [vmem:[%s531_s13 + $0x20] sm:$0xff] }
  0x17   : > { %v549_v13 = vld [vmem:[%s531_s13 + $0xb0] sm:$0xff]  ;;  %v552_v14 = vld [vmem:[%s531_s13 + $0x21] sm:$0xff]  ;;  %v198_v15 = vmax.f32 %v181_v8, %v397_v4 }
  0x18   : > { %v413_v16 = vld [vmem:[%s531_s13 + $0x121] sm:$0xff]  ;;  %v182_v17 = vmax.f32 %v166_v10, %v542_v7  ;;  %v167_v19 = vmax.f32 %v422_v12, %v549_v13  ;;  %v423_v21 = vld [vmem:[%s531_s13 + $0x30] sm:$0xff] }
  0x19   : > { %v406_v18 = vld [vmem:[%s531_s13 + $0x1c0] sm:$0xff]  ;;  %v564_v23 = vld [vmem:[%s531_s13 + $0x31] sm:$0xff]  ;;  %v215_v24 = vmax.f32 %v198_v15, %v405_v9 }
  0x1a   : > { %v399_v20 = vld [vmem:[%s531_s13 + $0x140] sm:$0xff]  ;;  %v199_v25 = vmax.f32 %v182_v17, %v398_v11  ;;  %v414_v26 = vld [vmem:[%s531_s13 + $0x131] sm:$0xff]  ;;  %v183_v27 = vmax.f32 %v167_v19, %v552_v14 }
  0x1b   : > { %v561_v22 = vld [vmem:[%s531_s13 + $0xc0] sm:$0xff]  ;;  %v407_v28 = vld [vmem:[%s531_s13 + $0x1d0] sm:$0xff]  ;;  %v231_v33 = vmax.f32 %v215_v24, %v413_v16 }
  0x1c   : > { %v168_v29 = vmax.f32 %v423_v21, %v561_v22  ;;  %v400_v30 = vld [vmem:[%s531_s13 + $0x150] sm:$0xff]  ;;  %v424_v31 = vld [vmem:[%s531_s13 + $0x40] sm:$0xff]  ;;  %v216_v34 = vmax.f32 %v199_v25, %v406_v18  ;;  %v200_v35 = vmax.f32 %v183_v27, %v399_v20 }
  0x1d   : > { %v573_v32 = vld [vmem:[%s531_s13 + $0xd0] sm:$0xff]  ;;  %v415_v36 = vld [vmem:[%s531_s13 + $0x141] sm:$0xff]  ;;  %v248_v43 = vmax.f32 %v231_v33, %v421_v5 }
  0x1e   : > { %v184_v37 = vmax.f32 %v168_v29, %v564_v23  ;;  %v578_v38 = vld [vmem:[%s531_s13 + $0x41] sm:$0xff]  ;;  %v169_v40 = vmax.f32 %v424_v31, %v573_v32  ;;  %v425_v41 = vld [vmem:[%s531_s13 + $0x50] sm:$0xff]  ;;  %v232_v44 = vmax.f32 %v216_v34, %v414_v26  ;;  %v217_v45 = vmax.f32 %v200_v35, %v407_v28 }
  0x1f   : > { %v408_v39 = vld [vmem:[%s531_s13 + $0x1e0] sm:$0xff]  ;;  %v441_v48 = vld [vmem:[%s531_s13 + $0x51] sm:$0xff]  ;;  %v265_v54 = vmax.f32 %v248_v43, %v539_v6 }
  0x20   : > { %v584_v42 = vld [vmem:[%s531_s13 + $0xe0] sm:$0xff]  ;;  %v201_v46 = vmax.f32 %v184_v37, %v400_v30  ;;  %v416_v49 = vld [vmem:[%s531_s13 + $0x151] sm:$0xff]  ;;  %v185_v50 = vmax.f32 %v169_v40, %v578_v38  ;;  %v249_v55 = vmax.f32 %v232_v44, %v422_v12  ;;  %v233_v56 = vmax.f32 %v217_v45, %v415_v36 }
  0x21   : > { %v401_v47 = vld [vmem:[%s531_s13 + $0x160] sm:$0xff]  ;;  %v170_v51 = vmax.f32 %v425_v41, %v584_v42  ;;  %v594_v53 = vld [vmem:[%s531_s13 + $0xf0] sm:$0xff]  ;;  %v281_v3 = vmax.f32 %v265_v54, %v542_v7 }
  0x22   : > { %v426_v52 = vld [vmem:[%s531_s13 + $0x60] sm:$0xff]  ;;  %v218_v57 = vmax.f32 %v201_v46, %v408_v39  ;;  %v409_v58 = vld [vmem:[%s531_s13 + $0x1f0] sm:$0xff]  ;;  %v202_v61 = vmax.f32 %v185_v50, %v401_v47  ;;  %v266_v4 = vmax.f32 %v249_v55, %v549_v13  ;;  %v250_v5 = vmax.f32 %v233_v56, %v423_v21 }
  0x23   : > { %v402_v59 = vld [vmem:[%s531_s13 + $0x170] sm:$0xff]  ;;  %v442_v60 = vld [vmem:[%s531_s13 + $0x61] sm:$0xff]  ;;  %v186_v63 = vmax.f32 %v170_v51, %v441_v48  ;;  %v171_v0 = vmax.f32 %v426_v52, %v594_v53  ;;  %290 = vst.msk [vmem:[%s603_s17] sm:$0xff] %vm289_vm0, %v281_v3 }
  0x24   : > { %v417_v62 = vld [vmem:[%s531_s13 + $0x161] sm:$0xff]  ;;  %v427_v1 = vld [vmem:[%s531_s13 + $0x70] sm:$0xff]  ;;  %v234_v6 = vmax.f32 %v218_v57, %v416_v49  ;;  %v219_v11 = vmax.f32 %v202_v61, %v409_v58  ;;  %v282_v7 = vmax.f32 %v266_v4, %v552_v14  ;;  %v267_v17 = vmax.f32 %v250_v5, %v561_v22 }
  0x25   : > { %v435_v2 = vld [vmem:[%s531_s13 + $0x100] sm:$0xff]  ;;  %v443_v10 = vld [vmem:[%s531_s13 + $0x71] sm:$0xff]  ;;  %v203_v12 = vmax.f32 %v186_v63, %v402_v59  ;;  %v187_v15 = vmax.f32 %v171_v0, %v442_v60 }
  0x26   : > { %v410_v8 = vld [vmem:[%s531_s13 + $0x200] sm:$0xff]  ;;  %v172_v16 = vmax.f32 %v427_v1, %v435_v2  ;;  %v251_v13 = vmax.f32 %v234_v6, %v424_v31  ;;  %v418_v18 = vld [vmem:[%s531_s13 + $0x171] sm:$0xff]  ;;  %v235_v21 = vmax.f32 %v219_v11, %v417_v62  ;;  %291 = vst.msk [vmem:[%s603_s17 + $0x8] sm:$0xff] %vm289_vm0, %v282_v7  ;;  %v283_v27 = vmax.f32 %v267_v17, %v564_v23 }
  0x27   : > { %v403_v9 = vld [vmem:[%s531_s13 + $0x180] sm:$0xff]  ;;  %v411_v19 = vld [vmem:[%s531_s13 + $0x210] sm:$0xff]  ;;  %v220_v24 = vmax.f32 %v203_v12, %v410_v8 }
  0x28   : > { %v404_v20 = vld [vmem:[%s531_s13 + $0x190] sm:$0xff]  ;;  %v204_v25 = vmax.f32 %v187_v15, %v403_v9  ;;  %v188_v26 = vmax.f32 %v172_v16, %v443_v10  ;;  %v268_v14 = vmax.f32 %v251_v13, %v573_v32  ;;  %v419_v28 = vld [vmem:[%s531_s13 + $0x181] sm:$0xff]  ;;  %v252_v29 = vmax.f32 %v235_v21, %v425_v41  ;;  %292 = vst.msk [vmem:[%s603_s17 + $0x10] sm:$0xff] %vm289_vm0, %v283_v27 }
  0x29   : > { %v412_v22 = vld [vmem:[%s531_s13 + $0x220] sm:$0xff]  ;;  %v236_v30 = vmax.f32 %v220_v24, %v418_v18  ;;  %v420_v35 = vld [vmem:[%s531_s13 + $0x191] sm:$0xff] }
  0x2a   : > { %v221_v31 = vmax.f32 %v204_v25, %v411_v19  ;;  %v205_v33 = vmax.f32 %v188_v26, %v404_v20  ;;  %v284_v34 = vmax.f32 %v268_v14, %v578_v38  ;;  %v269_v36 = vmax.f32 %v252_v29, %v584_v42  ;;  %v428_v39 = vld [vmem:[%s531_s13 + $0x80] sm:$0xff]  ;;  %v436_v45 = vld [vmem:[%s531_s13 + $0x110] sm:$0xff] }
  0x2b   : > { %v253_v23 = vmax.f32 %v236_v30, %v426_v52  ;;  %v444_v47 = vld [vmem:[%s531_s13 + $0x81] sm:$0xff] }
  0x2c   : > { %v237_v37 = vmax.f32 %v221_v31, %v419_v28  ;;  %v222_v32 = vmax.f32 %v205_v33, %v412_v22  ;;  %293 = vst.msk [vmem:[%s603_s17 + $0x18] sm:$0xff] %vm289_vm0, %v284_v34  ;;  %v285_v40 = vmax.f32 %v269_v36, %v441_v48 }
  0x2d   : > { %v270_v41 = vmax.f32 %v253_v23, %v594_v53 }
  0x2e   : > { %v254_v43 = vmax.f32 %v237_v37, %v427_v1  ;;  %v238_v44 = vmax.f32 %v222_v32, %v420_v35  ;;  %294 = vst.msk [vmem:[%s603_s17 + $0x20] sm:$0xff] %vm289_vm0, %v285_v40 }
  0x2f   : > { %v286_v38 = vmax.f32 %v270_v41, %v442_v60 }
  0x30   : > { %v271_v46 = vmax.f32 %v254_v43, %v435_v2  ;;  %v255_v42 = vmax.f32 %v238_v44, %v428_v39 }
  0x31   : > { %295 = vst.msk [vmem:[%s603_s17 + $0x28] sm:$0xff] %vm289_vm0, %v286_v38 }
  0x32   : > { %v287_v49 = vmax.f32 %v271_v46, %v443_v10  ;;  %v272_v50 = vmax.f32 %v255_v42, %v436_v45 }
  0x34   : > { %296 = vst.msk [vmem:[%s603_s17 + $0x30] sm:$0xff] %vm289_vm0, %v287_v49  ;;  %v288_v51 = vmax.f32 %v272_v50, %v444_v47 }
  0x36   : > { %297 = vst.msk [vmem:[%s603_s17 + $0x38] sm:$0xff] %vm289_vm0, %v288_v51 }
  0x37 PF: > { %s11_s8 = sadd.s32 1, %s495_s8   ;;  %s657_s6 = smov %s491_s7 }
  0x38   : > { %p8_p5 = scmp.ge.s32.totalorder %s11_s8, 4   ;;  %s658_s7 = smov %s660_s9 }
  0x3a   :  { %10 = sbr.rel (!%p8_p5) target bundleno = 2 (0x2), region = 59 }

</bundles_post_ra>
